<compile_context>
chip_gen: v7x
topology: tpu7x:2x2x1
jax: 0.10.0
libtpu: 0.0.40
codegen_flags: <defaults>
</compile_context>

<pallas_src>
import functools

import jax
import jax.numpy as jnp
from jax import lax
from jax.experimental import pallas as pl
from jax.experimental.pallas import tpu as pltpu

_LANES = 128
_DEFAULT_BLOCK_B = 8192
_MM_PRECISION = jax.lax.Precision.HIGHEST   # exact f32 MXU passes


# -----------------------------------------------------------------------------
# Parameter packing: 6 tensors -> one [rows, 128] f32 slab (single DMA, VMEM-resident)
# -----------------------------------------------------------------------------
def _pack_params(params):
    """params = ((w,b), (w,b), (w,b)) in PyTorch layout (w=[out,in], b=[out]).

    Slab rows per layer: lanes [0:in] hold w, lane [in] holds b as a column
    (ready for the batch-on-lanes  W @ x^T  formulation)."""
    blocks = []
    for w, b in params:
        out_f, in_f = w.shape
        assert in_f + 1 <= _LANES, "layer fan-in too large for a 128-lane slab"
        blk = jnp.zeros((out_f, _LANES), jnp.float32)
        blk = blk.at[:, :in_f].set(w.astype(jnp.float32))
        blk = blk.at[:, in_f].set(b.astype(jnp.float32))
        blocks.append(blk)
    slab = jnp.concatenate(blocks, axis=0)
    pad = (-slab.shape[0]) % 8
    if pad:
        slab = jnp.concatenate([slab, jnp.zeros((pad, _LANES), jnp.float32)], 0)
    return slab


def _param_dims(params):
    (w1, _), (w2, _), (w3, _) = params
    h1, in_f = w1.shape
    h2 = w2.shape[0]
    n_classes = w3.shape[0]
    assert w2.shape == (h2, h1) and w3.shape == (n_classes, h2)
    return (in_f, h1, h2, n_classes)


def _round_up(v, m):
    return -(-v // m) * m


def _pick_tile(batch, block_b):
    """Batch-tile size and grid length.

    Small batches use a single full-extent block.  Larger batches use tiles that are
    multiples of 128 (keeps the lane-dense (1, tb) margin block and the x/logits
    blocks (8,128)-aligned) and aim for >= 2 blocks so a v7x megacore can split the
    "parallel" batch axis across its two TensorCores."""
    if batch <= 256:
        return batch, 1
    tb = min(_round_up(block_b, 128), _round_up(-(-batch // 2), 128))
    tb = max(tb, 128)
    return tb, -(-batch // tb)


# -----------------------------------------------------------------------------
# Kernel bodies (batch-on-lanes compute: activations are [features, TB])
# -----------------------------------------------------------------------------
def _hidden_bol(x_ref, p_ref, dims):
    """Hidden layers. x_ref: natural-layout [TB, in_f] block; p_ref: packed slab.
    Returns h2 in batch-on-lanes layout [h2, TB] (batch dense on the 128 lanes)."""
    in_f, h1, h2, _ = dims
    r1, r2 = h1, h1 + h2
    w1 = p_ref[0:h1, 0:in_f]            # [h1, in_f]
    b1 = p_ref[0:h1, in_f:in_f + 1]     # [h1, 1]
    w2 = p_ref[r1:r2, 0:h1]             # [h2, h1]
    b2 = p_ref[r1:r2, h1:h1 + 1]        # [h2, 1]
    x = x_ref[...]                      # [TB, in_f]  (no transpose anywhere)
    # Layer 1: contract in_f of BOTH operands -> MXU emits [h1, TB] directly.
    h = lax.dot_general(w1, x, (((1,), (1,)), ((), ())),
                        precision=_MM_PRECISION,
                        preferred_element_type=jnp.float32)
    h = jnp.maximum(h + b1, 0.0)
    h = jnp.dot(w2, h, precision=_MM_PRECISION,
                preferred_element_type=jnp.float32)
    return jnp.maximum(h + b2, 0.0)     # [h2, TB]


def _logits_ct(h, p_ref, dims):
    """Output layer: [C, TB] logits (batch on lanes)."""
    _, h1, h2, C = dims
    r2 = h1 + h2
    w3 = p_ref[r2:r2 + C, 0:h2]         # [C, h2]
    b3 = p_ref[r2:r2 + C, h2:h2 + 1]    # [C, 1]
    return jnp.dot(w3, h, precision=_MM_PRECISION,
                   preferred_element_type=jnp.float32) + b3


def _margin_row(logits_ct, true_class):
    """min_{i!=t}(logit_t - logit_i) == logit_t - max_{i!=t} logit_i.
    Equivalent to the +/-1 property matmul followed by torch.min(dim=1).
    Returns a lane-dense [1, TB] row (batch on lanes -> unmasked stores)."""
    cls = lax.broadcasted_iota(jnp.int32, logits_ct.shape, 0)
    is_true = cls == true_class
    neg = jnp.finfo(jnp.float32).min
    logit_true = jnp.max(jnp.where(is_true, logits_ct, neg), axis=0, keepdims=True)
    other_max = jnp.max(jnp.where(is_true, neg, logits_ct), axis=0, keepdims=True)
    return logit_true - other_max


def _forward_kernel(x_ref, p_ref, out_ref, *, dims):
    h = _hidden_bol(x_ref, p_ref, dims)
    out_ref[...] = _logits_ct(h, p_ref, dims).astype(out_ref.dtype)          # [C, TB]


def _verif_kernel(tc_ref, x_ref, p_ref, out_ref, *, dims):
    h = _hidden_bol(x_ref, p_ref, dims)
    logits_ct = _logits_ct(h, p_ref, dims)
    out_ref[...] = _margin_row(logits_ct, tc_ref[0]).astype(out_ref.dtype)   # [1, TB]


def _fused_kernel(tc_ref, x_ref, p_ref, logits_ref, verif_ref, *, dims):
    h = _hidden_bol(x_ref, p_ref, dims)
    logits_ct = _logits_ct(h, p_ref, dims)
    logits_ref[...] = logits_ct.astype(logits_ref.dtype)
    verif_ref[...] = _margin_row(logits_ct, tc_ref[0]).astype(verif_ref.dtype)


# -----------------------------------------------------------------------------
# Jitted pallas_call wrappers
# -----------------------------------------------------------------------------
# "parallel" is safe on every generation; on v7x, pltpu.CORE_PARALLEL on this axis is
# the explicit 2-TensorCore split (the tiling above already guarantees >= 2 blocks).
_DIM_SEMANTICS = ("parallel",)


@functools.partial(jax.jit, static_argnames=("dims", "block_b", "transpose_out"))
def _forward_call(x, slab, *, dims, block_b, transpose_out=True):
    in_f, _, _, C = dims
    B = x.shape[0]
    x = x.astype(jnp.float32)
    tb, nb = _pick_tile(B, block_b)
    logits_cb = pl.pallas_call(
        functools.partial(_forward_kernel, dims=dims),
        out_shape=jax.ShapeDtypeStruct((C, B), jnp.float32),
        grid_spec=pltpu.PrefetchScalarGridSpec(
            num_scalar_prefetch=0,
            grid=(nb,),
            in_specs=[
                pl.BlockSpec((tb, in_f), lambda i: (i, 0)),    # x streams, natural layout
                pl.BlockSpec(slab.shape, lambda i: (0, 0)),    # params VMEM-resident
            ],
            out_specs=pl.BlockSpec((C, tb), lambda i: (0, i)),  # lane-dense [C, TB]
        ),
        compiler_params=pltpu.CompilerParams(dimension_semantics=_DIM_SEMANTICS),
    )(x, slab)
    return jnp.transpose(logits_cb) if transpose_out else logits_cb


@functools.partial(jax.jit, static_argnames=("dims", "block_b"))
def _verif_call(x, slab, true_class_index, *, dims, block_b):
    in_f, _, _, C = dims
    B = x.shape[0]
    x = x.astype(jnp.float32)
    tb, nb = _pick_tile(B, block_b)
    tc = jnp.clip(jnp.asarray(true_class_index, jnp.int32), 0, C - 1).reshape(1)
    margin = pl.pallas_call(
        functools.partial(_verif_kernel, dims=dims),
        out_shape=jax.ShapeDtypeStruct((1, B), jnp.float32),
        grid_spec=pltpu.PrefetchScalarGridSpec(
            num_scalar_prefetch=1,
            grid=(nb,),
            in_specs=[
                pl.BlockSpec((tb, in_f), lambda i, tc_ref: (i, 0)),
                pl.BlockSpec(slab.shape, lambda i, tc_ref: (0, 0)),
            ],
            out_specs=pl.BlockSpec((1, tb), lambda i, tc_ref: (0, i)),  # lane-dense row
        ),
        compiler_params=pltpu.CompilerParams(dimension_semantics=_DIM_SEMANTICS),
    )(tc, x, slab)
    return margin.reshape(B, 1)


@functools.partial(jax.jit, static_argnames=("dims", "block_b"))
def _fused_call(x, slab, true_class_index, *, dims, block_b):
    in_f, _, _, C = dims
    B = x.shape[0]
    x = x.astype(jnp.float32)
    tb, nb = _pick_tile(B, block_b)
    tc = jnp.clip(jnp.asarray(true_class_index, jnp.int32), 0, C - 1).reshape(1)
    logits_cb, margin = pl.pallas_call(
        functools.partial(_fused_kernel, dims=dims),
        out_shape=(jax.ShapeDtypeStruct((C, B), jnp.float32),
                   jax.ShapeDtypeStruct((1, B), jnp.float32)),
        grid_spec=pltpu.PrefetchScalarGridSpec(
            num_scalar_prefetch=1,
            grid=(nb,),
            in_specs=[
                pl.BlockSpec((tb, in_f), lambda i, tc_ref: (i, 0)),
                pl.BlockSpec(slab.shape, lambda i, tc_ref: (0, 0)),
            ],
            out_specs=[
                pl.BlockSpec((C, tb), lambda i, tc_ref: (0, i)),
                pl.BlockSpec((1, tb), lambda i, tc_ref: (0, i)),
            ],
        ),
        compiler_params=pltpu.CompilerParams(dimension_semantics=_DIM_SEMANTICS),
    )(tc, x, slab)
    return jnp.transpose(logits_cb), margin.reshape(B, 1)


# -----------------------------------------------------------------------------
# Public module mirroring the PyTorch class
# -----------------------------------------------------------------------------
class SymVerificationNetwork:
    """Pallas-TPU forward passes of the PyTorch SymVerificationNetwork."""

    def __init__(self, params, *, block_b=_DEFAULT_BLOCK_B):
        self.dims = _param_dims(params)           # (in_f, h1, h2, n_classes)
        self.block_b = int(block_b)
        self.slab = _pack_params(params)          # packed ONCE, outside jit

    def forward(self, x):
        """base_network(x) -> [B, n_classes]."""
        return _forward_call(x, self.slab, dims=self.dims, block_b=self.block_b)

    def forward_t(self, x):
        """Same logits in [n_classes, B] layout (skips the small final transpose)."""
        return _forward_call(x, self.slab, dims=self.dims, block_b=self.block_b,
                             transpose_out=False)

    def forward_verif(self, x, true_class_index):
        """min_{i != t}(logit_t - logit_i) -> [B, 1]; class index may be traced."""
        return _verif_call(x, self.slab, true_class_index,
                           dims=self.dims, block_b=self.block_b)

    def forward_and_verif(self, x, true_class_index):
        """Single fused launch -> (logits [B, C], margin [B, 1])."""
        return _fused_call(x, self.slab, true_class_index,
                           dims=self.dims, block_b=self.block_b)


# -----------------------------------------------------------------------------
# Deterministic parameter construction (PyTorch layout) + pure-JAX references
# -----------------------------------------------------------------------------
def init_params(key, in_features=16, hidden=32, n_classes=10):
    """PyTorch-layout parameters: Linear weight [out, in], bias [out]."""
    ks = jax.random.split(key, 6)
    w1 = jax.random.normal(ks[0], (hidden, in_features), jnp.float32) * 0.1
    b1 = jax.random.normal(ks[1], (hidden,), jnp.float32) * 0.1
    w2 = jax.random.normal(ks[2], (hidden, hidden), jnp.float32) * 0.1
    b2 = jax.random.normal(ks[3], (hidden,), jnp.float32) * 0.1
    w3 = jax.random.normal(ks[4], (n_classes, hidden), jnp.float32) * 0.1
    b3 = jax.random.normal(ks[5], (n_classes,), jnp.float32) * 0.1
    return ((w1, b1), (w2, b2), (w3, b3))


def _reference_forward(x, params):
    (w1, b1), (w2, b2), (w3, b3) = params
    h = jnp.maximum(jnp.dot(x, w1.T, precision=_MM_PRECISION) + b1, 0.0)
    h = jnp.maximum(jnp.dot(h, w2.T, precision=_MM_PRECISION) + b2, 0.0)
    return jnp.dot(h, w3.T, precision=_MM_PRECISION) + b3


def _reference_forward_verif(x, params, true_class_index):
    logits = _reference_forward(x, params)
    C = logits.shape[1]
    rows = []
    for i in range(C):                 # attach_property_layers (+1 true, -1 other)
        if i == true_class_index:
            continue
        r = [0.0] * C
        r[true_class_index] = 1.0
        r[i] = -1.0
        rows.append(r)
    prop = jnp.asarray(rows, jnp.float32)
    return jnp.min(jnp.dot(logits, prop.T, precision=_MM_PRECISION),
                   axis=1, keepdims=True)


if __name__ == "__main__":
    key = jax.random.PRNGKey(0)
    kx, kp, kx2 = jax.random.split(key, 3)

    batch, in_features, hidden, n_classes = 8, 16, 32, 10
    true_class_index = 3

    x = jax.random.normal(kx, (batch, in_features), jnp.float32)
    params = init_params(kp, in_features, hidden, n_classes)
    net = SymVerificationNetwork(params)

    # forward / forward_verif / fused
    logits = net.forward(x)
    verif = net.forward_verif(x, true_class_index)
    logits_f, verif_f = net.forward_and_verif(x, true_class_index)
    jax.block_until_ready((logits, verif, logits_f, verif_f))

    ref_logits = _reference_forward(x, params)
    ref_verif = _reference_forward_verif(x, params, true_class_index)
    assert logits.shape == (batch, n_classes)
    assert verif.shape == (batch, 1)
    assert jnp.allclose(logits, ref_logits, atol=1e-4, rtol=1e-4)
    assert jnp.allclose(verif, ref_verif, atol=1e-4, rtol=1e-4)
    assert jnp.allclose(logits_f, ref_logits, atol=1e-4, rtol=1e-4)
    assert jnp.allclose(verif_f, ref_verif, atol=1e-4, rtol=1e-4)

    # Dynamic true_class: a different class value reuses the same compiled kernel.
    verif5 = net.forward_verif(x, 5)
    assert jnp.allclose(verif5, _reference_forward_verif(x, params, 5),
                        atol=1e-4, rtol=1e-4)

    # Multi-block grid with a ragged edge block (B=300 -> tb=256, grid=(2,)).
    xb = jax.random.normal(kx2, (300, in_features), jnp.float32)
    lb = net.forward(xb)
    vb = net.forward_verif(xb, 2)
    jax.block_until_ready((lb, vb))
    assert lb.shape == (300, n_classes) and vb.shape == (300, 1)
    assert jnp.allclose(lb, _reference_forward(xb, params), atol=1e-4, rtol=1e-4)
    assert jnp.allclose(vb, _reference_forward_verif(xb, params, 2),
                        atol=1e-4, rtol=1e-4)

    print("KERNEL_OK")
</pallas_src>

<mosaic_0001>
module attributes {stable_mosaic.version = 11 : i64} {
  func.func @_forward_kernel(%arg0: i32, %arg1: memref<8x16xf32, #tpu.memory_space<vmem>>, %arg2: memref<80x128xf32, #tpu.memory_space<vmem>>, %arg3: memref<10x8xf32, #tpu.memory_space<vmem>>) attributes {dimension_semantics = [#tpu.dimension_semantics<parallel>], iteration_bounds = array<i64: 1>, scalar_prefetch = 0 : i64, scratch_operands = 0 : i64, tpu.core_type = #tpu.core_type<tc>, window_params = [{transform_indices = @transform_0, window_bounds = array<i64: 8, 16>}, {pipeline_mode = #tpu.pipeline_mode<synchronous>, transform_indices = @transform_1, window_bounds = array<i64: 80, 128>}, {transform_indices = @transform_2, window_bounds = array<i64: 10, 8>}]} {
    %c0 = arith.constant 0 : index
    %c0_0 = arith.constant 0 : index
    %0 = vector.load %arg2[%c0, %c0_0] : memref<80x128xf32, #tpu.memory_space<vmem>>, vector<32x16xf32>
    %c0_1 = arith.constant 0 : index
    %c16 = arith.constant 16 : index
    %1 = vector.load %arg2[%c0_1, %c16] : memref<80x128xf32, #tpu.memory_space<vmem>>, vector<32x1xf32>
    %c32 = arith.constant 32 : index
    %c0_2 = arith.constant 0 : index
    %2 = vector.load %arg2[%c32, %c0_2] : memref<80x128xf32, #tpu.memory_space<vmem>>, vector<32x32xf32>
    %c32_3 = arith.constant 32 : index
    %c32_4 = arith.constant 32 : index
    %3 = vector.load %arg2[%c32_3, %c32_4] : memref<80x128xf32, #tpu.memory_space<vmem>>, vector<32x1xf32>
    %c0_5 = arith.constant 0 : index
    %c0_6 = arith.constant 0 : index
    %4 = vector.load %arg1[%c0_5, %c0_6] : memref<8x16xf32, #tpu.memory_space<vmem>>, vector<8x16xf32>
    %cst = arith.constant dense<0.000000e+00> : vector<32x8xf32>
    %5 = tpu.matmul %0, %4, %cst {dimension_numbers = #tpu.dot_dimension_numbers<[1], [1], [0], [0], [0, 0, 1, 0], [], []>, precision = #tpu.contract_precision<fp32>} : vector<32x16xf32>, vector<8x16xf32>, vector<32x8xf32> -> vector<32x8xf32>
    %6 = vector.broadcast %1 : vector<32x1xf32> to vector<32x8xf32>
    %7 = arith.addf %5, %6 : vector<32x8xf32>
    %cst_7 = arith.constant 0.000000e+00 : f32
    %8 = vector.broadcast %cst_7 : f32 to vector<32x8xf32>
    %9 = arith.maximumf %7, %8 : vector<32x8xf32>
    %cst_8 = arith.constant dense<0.000000e+00> : vector<32x8xf32>
    %10 = tpu.matmul %2, %9, %cst_8 {dimension_numbers = #tpu.dot_dimension_numbers<[1], [0], [0], [1], [0, 0, 1, 1], [], []>, precision = #tpu.contract_precision<fp32>} : vector<32x32xf32>, vector<32x8xf32>, vector<32x8xf32> -> vector<32x8xf32>
    %11 = vector.broadcast %3 : vector<32x1xf32> to vector<32x8xf32>
    %12 = arith.addf %10, %11 : vector<32x8xf32>
    %cst_9 = arith.constant 0.000000e+00 : f32
    %13 = vector.broadcast %cst_9 : f32 to vector<32x8xf32>
    %14 = arith.maximumf %12, %13 : vector<32x8xf32>
    %c64 = arith.constant 64 : index
    %c0_10 = arith.constant 0 : index
    %15 = vector.load %arg2[%c64, %c0_10] : memref<80x128xf32, #tpu.memory_space<vmem>>, vector<10x32xf32>
    %c64_11 = arith.constant 64 : index
    %c32_12 = arith.constant 32 : index
    %16 = vector.load %arg2[%c64_11, %c32_12] : memref<80x128xf32, #tpu.memory_space<vmem>>, vector<10x1xf32>
    %cst_13 = arith.constant dense<0.000000e+00> : vector<10x8xf32>
    %17 = tpu.matmul %15, %14, %cst_13 {dimension_numbers = #tpu.dot_dimension_numbers<[1], [0], [0], [1], [0, 0, 1, 1], [], []>, precision = #tpu.contract_precision<fp32>} : vector<10x32xf32>, vector<32x8xf32>, vector<10x8xf32> -> vector<10x8xf32>
    %18 = vector.broadcast %16 : vector<10x1xf32> to vector<10x8xf32>
    %19 = arith.addf %17, %18 : vector<10x8xf32>
    %c0_14 = arith.constant 0 : index
    %c0_15 = arith.constant 0 : index
    %20 = vector.load %arg3[%c0_14, %c0_15] : memref<10x8xf32, #tpu.memory_space<vmem>>, vector<10x8xf32>
    tpu.vector_store %arg3[%c0_14, %c0_15], %19 {strides = array<i32>} : memref<10x8xf32, #tpu.memory_space<vmem>>, vector<10x8xf32>,
    return
  }
  func.func @transform_0(%arg0: i32) -> (i32, i32) {
    %c0_i32 = arith.constant 0 : i32
    %c0_i32_0 = arith.constant 0 : i32
    return %arg0, %c0_i32 : i32, i32
  }
  func.func @transform_1(%arg0: i32) -> (i32, i32) {
    %c0_i32 = arith.constant 0 : i32
    %c0_i32_0 = arith.constant 0 : i32
    %c0_i32_1 = arith.constant 0 : i32
    return %c0_i32, %c0_i32_0 : i32, i32
  }
  func.func @transform_2(%arg0: i32) -> (i32, i32) {
    %c0_i32 = arith.constant 0 : i32
    %c0_i32_0 = arith.constant 0 : i32
    return %c0_i32, %arg0 : i32, i32
  }
}

</mosaic_0001>

<bundles_post_ra>
// kernel: _forward_call.1
= control target key start
LH: loop header
LB: loop body
LE: loop exit
PB: predicated region body
PF: predicated region fallthrough
CT: control target
= control target key end

     0   :  { %7 = vsyncpa [#allocation3], 0  ;;  %s2551_s0 = inlined_call_operand.hbm [shape: f32[8,16], index: 0, kind: input, shape index: {}]   ;;  %s2552_s1 = inlined_call_operand.hbm [shape: f32[80,128], index: 1, kind: input, shape index: {}]   ;;  %s2553_s2 = inlined_call_operand.vmem [shape: f32[10,8], index: 2, kind: output, shape index: {}]  }
   0x1   :  { %8 = vsyncpa [#allocation5], 0  ;;  %s2384_s9 = smov [#allocation2]   ;;  %s2385_s11 = smov [#allocation4]  }
   0x2   :  { %s15_s10 = sshll.u32 %s2384_s9, 4  ;;  %s24_s12 = sshll.u32 %s2385_s11, 4  ;;  %s16_s10 = int_to_ptr.vmem [resolvable:$true] %s15_s10  ;;  %s2405_s12 = int_to_ptr.vmem [resolvable:$true] %s24_s12 }
   0x3   :  { %s2336_s15 = scalar_lea.hbm %s2551_s0, 128 }
   0x4   :  { %p2337_p0 = scmp.ne.s32.totalorder %s2551_s0, %s2336_s15  ;;  %p2340_p1 = scmp.lt.u32.totalorder %s2336_s15, %s2551_s0 }
   0x6   :  { %p2342_p2 = pnand %p2340_p1, %p2337_p0 }
   0x8   :  { %2345 = shalt.err (!%p2342_p2)
}
   0x9   :  { %s2346_s20 = scalar_lea.vmem %s16_s10, 128  ;;  %p2351_p4 = scmp.lt.s32.totalorder %s16_s10, %s16_s10 }
   0xa   :  { %p2347_p3 = scmp.ne.s32.totalorder %s16_s10, %s2346_s20  ;;  %p2352_p5 = scmp.lt.s32.totalorder %s2346_s20, %s2346_s20 }
   0xc   :  { %p2353_p6 = por %p2352_p5, %p2351_p4 }
   0xe   :  { %p2354_p7 = pnand %p2353_p6, %p2347_p3 }
  0x10   :  { %2357 = shalt.err (!%p2354_p7)
}
  0x11   :  { %18 = dma.hbm_to_vmem [thread:$0]  %s2551_s0, 128, %s16_s10, [#allocation3]  }
  0x12   :  { %s2358_s25 = scalar_lea.hbm %s2552_s1, 1280 }
  0x13   :  { %p2359_p8 = scmp.ne.s32.totalorder %s2552_s1, %s2358_s25  ;;  %p2362_p9 = scmp.lt.u32.totalorder %s2358_s25, %s2552_s1 }
  0x15   :  { %p2364_p10 = pnand %p2362_p9, %p2359_p8 }
  0x17   :  { %2367 = shalt.err (!%p2364_p10)
}
  0x18   :  { %s2368_s30 = scalar_lea.vmem %s2405_s12, 1280  ;;  %p2373_p12 = scmp.lt.s32.totalorder %s2405_s12, %s2405_s12 }
  0x19   :  { %p2369_p11 = scmp.ne.s32.totalorder %s2405_s12, %s2368_s30  ;;  %p2374_p13 = scmp.lt.s32.totalorder %s2368_s30, %s2368_s30 }
  0x1b   :  { %p2375_p0 = por %p2374_p13, %p2373_p12 }
  0x1d   :  { %p2376_p1 = pnand %p2375_p0, %p2369_p11 }
  0x1f   :  { %2379 = shalt.err (!%p2376_p1)
}
  0x20   :  { %s2386_s0 = smov 128   ;;  %s2387_s3 = smov 8  }
  0x21   :  { %30 = dma.hbm_to_vmem [thread:$0]  %s2552_s1, 1280, %s2405_s12, [#allocation5], %s2386_s0, %s2386_s0, %s2387_s3  }
  0x22   :  { %2380 = dma.done.wait [#allocation3], 128  }
  0x23   :  { %2381 = vsyncadd [#allocation3], 4294967168 }
  0x24   :  { %2382 = dma.done.wait [#allocation5], 1280  }
  0x25   :  { %2383 = vsyncadd [#allocation5], 4294966016  ;;  %v2388_v0 = vmov 16   ;;  %vm66_vm0 = vcmask 130048   ;;  %v45_v1 = vld [vmem:[#allocation2] sm:$0xff]  ;;  %v37_v2 = vld [vmem:[#allocation4] sm:$0xff] }
  0x26   :  { %2332 = vset.pattern.permute.xlu0 %v2388_v0  ;;  %2333 = vset.pattern.permute.xlu1 %v2388_v0  ;;  %v38_v3 = vld [vmem:[#allocation4 + $0x8] sm:$0xff]  ;;  %v76_v4 = vsel %vm66_vm0, %v45_v1, 0  ;;  %v67_v5 = vsel %vm66_vm0, %v37_v2, 0  ;;  %v39_v7 = vld [vmem:[#allocation4 + $0x10] sm:$0xff]  ;;  %v40_v8 = vld [vmem:[#allocation4 + $0x18] sm:$0xff]  ;;  %vm677_vm1 = vcmask 261120  }
  0x27   :  { %v69_v6 = vsel %vm66_vm0, %v38_v3, 0  ;;  %48 = vperm.xlu0 %2332, %v37_v2   ;;  %v79_v9 = vand.u32 4294901760, %v76_v4  ;;  %v144_v10 = vand.u32 4294901760, %v67_v5  ;;  %v71_v12 = vsel %vm66_vm0, %v39_v7, 0  ;;  %58 = vperm.xlu1 %2333, %v39_v7   ;;  %v41_v36 = vld [vmem:[#allocation4 + $0x20] sm:$0xff]  ;;  %v42_v38 = vld [vmem:[#allocation4 + $0x28] sm:$0xff] }
  0x28   :  { %v154_v11 = vand.u32 4294901760, %v69_v6  ;;  %v164_v13 = vand.u32 4294901760, %v71_v12  ;;  %v73_v14 = vsel %vm66_vm0, %v40_v8, 0  ;;  %v678_v37 = vsel %vm677_vm1, %v41_v36, 0  ;;  %v43_v42 = vld [vmem:[#allocation4 + $0x30] sm:$0xff]  ;;  %v44_v44 = vld [vmem:[#allocation4 + $0x38] sm:$0xff] }
  0x29   :  { %v186_v15 = vsub.f32 %v76_v4, %v79_v9  ;;  %v145_v16 = vsub.f32 %v67_v5, %v144_v10  ;;  %1972 = vmatprep.subr.mxu1 %v79_v9  ;;  %v174_v18 = vand.u32 4294901760, %v73_v14  ;;  %v2442_v39 = vand.u32 4294901760, %v678_v37  ;;  %v1304_v49 = vld [vmem:[#allocation4 + $0x40] sm:$0xff]  ;;  %v1305_v50 = vld [vmem:[#allocation4 + $0x48] sm:$0x3] }
  0x2a   :  { %v155_v17 = vsub.f32 %v69_v6, %v154_v11  ;;  %1973 = vmatpush3.xpose.msra.mxu1 %v79_v9  ;;  %v165_v19 = vsub.f32 %v71_v12, %v164_v13  ;;  %v680_v40 = vsel %vm677_vm1, %v42_v38, 0  ;;  %v682_v43 = vsel %vm677_vm1, %v43_v42, 0 }
  0x2b   :  { %53 = vperm.xlu0 %2332, %v38_v3   ;;  %1988 = vmatprep.subr.mxu0 %v186_v15  ;;  %v146_v20 = vand.u32 4294901760, %v145_v16  ;;  %v175_v21 = vsub.f32 %v73_v14, %v174_v18  ;;  %v187_v23 = vand.u32 4294901760, %v186_v15  ;;  %v2446_v41 = vsub.f32 %v678_v37, %v2442_v39 }
  0x2c   :  { %1990 = vmatprep.mubr.f32.mxu0 %v145_v16  ;;  %v156_v22 = vand.u32 4294901760, %v155_v17  ;;  %1989 = vmatpush3.xpose.msra.mxu0 %v186_v15  ;;  %v166_v24 = vand.u32 4294901760, %v165_v19  ;;  %v684_v46 = vsel %vm677_vm1, %v44_v44, 0  ;;  %v2389_v51 = vmov 32  }
  0x2d   :  { %63 = vperm.xlu1 %2333, %v40_v8   ;;  %1996 = vmatprep.subr.mxu0 %v79_v9  ;;  %v147_v25 = vsub.f32 %v145_v16, %v146_v20  ;;  %v176_v27 = vand.u32 4294901760, %v175_v21  ;;  %v188_v28 = vsub.f32 %v186_v15, %v187_v23  ;;  %v757_v45 = vand.u32 4294901760, %v2446_v41 }
  0x2e   :  { %v157_v26 = vsub.f32 %v155_v17, %v156_v22  ;;  %v167_v29 = vsub.f32 %v165_v19, %v166_v24  ;;  %v2455_v52 = vsel %vm677_vm1, %v1304_v49, 0  ;;  %v2458_v53 = vsel %vm677_vm1, %v1305_v50, 0 }
  0x2f   :  { %1991 = vmatmul.mubr.f32.vlgmr.msra.gmra.mrb[0].mxu0 %v155_v17  ;;  %v148_v30 = vand.u32 4294901760, %v147_v25  ;;  %v177_v32 = vsub.f32 %v175_v21, %v176_v27  ;;  %v189_v33 = vand.u32 4294901760, %v188_v28  ;;  %v758_v47 = vsub.f32 %v2446_v41, %v757_v45  ;;  %2334 = vset.pattern.permute.xlu0 %v2389_v51 }
  0x30   :  { %v158_v31 = vand.u32 4294901760, %v157_v26  ;;  %1997 = vmatpush3.xpose.msra.mxu0 %v79_v9  ;;  %1993 = vmatprep.mubr.f32.mxu0 %v165_v19  ;;  %v168_v34 = vand.u32 4294901760, %v167_v29  ;;  %v2461_v54 = vand.u32 4294901760, %v2455_v52  ;;  %v2464_v62 = vand.u32 4294901760, %v680_v40 }
  0x31   :  { %1974 = vmatprep.mubr.f32.mxu1 %v148_v30  ;;  %2004 = vmatprep.subr.mxu0 %v187_v23  ;;  %v178_v35 = vand.u32 4294901760, %v177_v32  ;;  %v759_v48 = vand.u32 4294901760, %v758_v47  ;;  %v2466_v0 = vand.u32 4294901760, %v682_v43  ;;  %v2471_v8 = vand.u32 4294901760, %v684_v46 }
  0x32   :  { %1975 = vmatmul.mubr.f32.vlgmr.msra.gmra.mrb[0].mxu1 %v158_v31  ;;  %1980 = vmatprep.subr.mxu1 %v189_v33  ;;  %v2469_v6 = vsub.f32 %v680_v40, %v2464_v62  ;;  %vm1850_vm2 = vcmask 58368   ;;  %vm1848_vm3 = vcmask 64512  }
  0x33   :  { %1994 = vmatmul.mubr.f32.gmra.mrb[2].mxu0 %v175_v21  ;;  %1977 = vmatprep.mubr.f32.mxu1 %v168_v34  ;;  %v2478_v21 = vsub.f32 %v684_v46, %v2471_v8 }
  0x34   :  { %1998 = vmatprep.mubr.f32.mxu0 %v146_v20  ;;  %1981 = vmatpush3.xpose.msra.mxu1 %v189_v33 }
  0x35   :  { %2335 = vset.pattern.permute.xlu1 %v2389_v51  ;;  %659 = vperm.xlu0 %2334, %v41_v36   ;;  %v787_v33 = vand.u32 4294901760, %v2478_v21 }
  0x36   :  { %1978 = vmatmul.mubr.f32.gmra.mrb[2].mxu1 %v178_v35  ;;  %664 = vperm.xlu1 %2335, %v42_v38  }
  0x37   :  { %1999 = vmatmul.mubr.f32.vlgmr.msra.gmra.mrb[0].mxu0 %v156_v22  ;;  %1982 = vmatprep.mubr.f32.mxu1 %v144_v10 }
  0x38   :  { %2005 = vmatpush3.xpose.msra.mxu0 %v187_v23  ;;  %2001 = vmatprep.mubr.f32.mxu0 %v166_v24 }
  0x39   :  { %2012 = vmatprep.subr.mxu0 %v79_v9  ;;  %674 = vperm.xlu0 %2334, %v44_v44  }
  0x3a   :  { %1983 = vmatmul.mubr.f32.vlgmr.msra.gmra.mrb[0].mxu1 %v154_v11  ;;  %669 = vperm.xlu1 %2335, %v43_v42  }
  0x3b   :  { %2002 = vmatmul.mubr.f32.gmra.mrb[2].mxu0 %v176_v27  ;;  %1985 = vmatprep.mubr.f32.mxu1 %v164_v13 }
  0x3c   :  { %2006 = vmatprep.mubr.f32.mxu0 %v144_v10 }
  0x3d   :  { %1313 = vperm.xlu0 %2334, %v1305_v50   ;;  %v788_v50 = vsub.f32 %v2478_v21, %v787_v33 }
  0x3e   :  { %1986 = vmatmul.mubr.f32.gmra.mrb[2].mxu1 %v174_v18  ;;  %1308 = vperm.xlu1 %2335, %v1304_v49  }
  0x3f   :  { %2007 = vmatmul.mubr.f32.vlgmr.msra.gmra.mrb[0].mxu0 %v154_v11  ;;  %2028 = vmatprep.mubr.f32.mxu1 %v759_v48 }
  0x40   :  { %2013 = vmatpush3.xpose.msra.mxu0 %v79_v9  ;;  %2009 = vmatprep.mubr.f32.mxu0 %v164_v13 }
  0x43   :  { %2010 = vmatmul.mubr.f32.gmra.mrb[2].mxu0 %v174_v18 }
  0x44   :  { %2014 = vmatprep.mubr.f32.mxu0 %v144_v10 }
  0x47   :  { %2015 = vmatmul.mubr.f32.vlgmr.msra.gmra.mrb[0].mxu0 %v154_v11  ;;  %v2474_v11 = vsub.f32 %v682_v43, %v2466_v0 }
  0x48   :  { %2017 = vmatprep.mubr.f32.mxu0 %v164_v13 }
  0x49   :  { %v777_v24 = vand.u32 4294901760, %v2474_v11 }
  0x4b   :  { %2018 = vmatmul.mubr.f32.gmra.mrb[2].mxu0 %v174_v18  ;;  %v767_v18 = vand.u32 4294901760, %v2469_v6  ;;  %v778_v37 = vsub.f32 %v2474_v11, %v777_v24 }
  0x4c   :  { %2123 = vmatprep.mubr.f32.mxu0 %v2461_v54 }
  0x4d   :  { %v768_v30 = vsub.f32 %v2469_v6, %v767_v18 }
  0x4f   :  { %v769_v46 = vand.u32 4294901760, %v768_v30 }
  0xa6   :  { %v49_v57 = vpop.permute.xlu0 %48  ;;  %v59_v60 = vpop.permute.xlu1 %58 }
  0xaa   :  { %v54_v61 = vpop.permute.xlu0 %53 }
  0xac   :  { %v64_v2 = vpop.permute.xlu1 %63 }
 0x10d   :  { %v1984_v55 = vpop.f32.mrb[0].mxu1 }
 0x10e   :  { %v256_v56 = vpop.f32.mrb[1].mxu1  ;;  %v2266_v63 = vadd.f32 %v1984_v55, %v54_v61  ;;  %v779_v55 = vand.u32 4294901760, %v778_v37  ;;  %v789_v61 = vand.u32 4294901760, %v788_v50 }
 0x10f   :  { %v2268_v1 = vadd.f32 %v256_v56, %v49_v57 }
 0x111   :  { %v1987_v58 = vpop.f32.mrb[2].mxu1 }
 0x112   :  { %v268_v59 = vpop.f32.mrb[3].mxu1  ;;  %v2270_v9 = vadd.f32 %v1987_v58, %v64_v2 }
 0x113   :  { %v2272_v12 = vadd.f32 %v268_v59, %v59_v60 }
 0x11a   :  { %v2016_v3 = vpop.f32.mrb[0].mxu0 }
 0x11b   :  { %v2267_v4 = vadd.f32 %v2266_v63, %v2016_v3  ;;  %v631_v5 = vpop.f32.mrb[1].mxu0 }
 0x11c   :  { %v2269_v7 = vadd.f32 %v2268_v1, %v631_v5 }
 0x11d   :  { %v654_v10 = vmax.f32 %v2267_v4, 0.0  ;;  %v665_v4 = vpop.permute.xlu1 %664 }
 0x11e   :  { %v653_v13 = vmax.f32 %v2269_v7, 0.0  ;;  %v2019_v14 = vpop.f32.mrb[2].mxu0 }
 0x11f   :  { %v690_v15 = vand.u32 4294901760, %v654_v10  ;;  %v2271_v16 = vadd.f32 %v2270_v9, %v2019_v14  ;;  %v643_v17 = vpop.f32.mrb[3].mxu0 }
 0x120   :  { %v687_v19 = vand.u32 4294901760, %v653_v13  ;;  %v2273_v20 = vadd.f32 %v2272_v12, %v643_v17 }
 0x121   :  { %v804_v22 = vsub.f32 %v654_v10, %v690_v15  ;;  %v656_v23 = vmax.f32 %v2271_v16, 0.0  ;;  %v670_v12 = vpop.permute.xlu1 %669 }
 0x122   :  { %v2481_v25 = vpack.c.bf16 %v690_v15, %v687_v19  ;;  %v797_v26 = vsub.f32 %v653_v13, %v687_v19  ;;  %v655_v27 = vmax.f32 %v2273_v20, 0.0 }
 0x123   :  { %v805_v28 = vand.u32 4294901760, %v804_v22  ;;  %v696_v29 = vand.u32 4294901760, %v656_v23 }
 0x124   :  { %v798_v31 = vand.u32 4294901760, %v797_v26  ;;  %v693_v32 = vand.u32 4294901760, %v655_v27  ;;  %2171 = vmatprep.subr.bf16.mxu1 %v2481_v25  ;;  %v2186_v34 = vpack.c.bf16 %v804_v22, %v797_v26 }
 0x125   :  { %v818_v35 = vsub.f32 %v656_v23, %v696_v29  ;;  %2173 = vmatpush3.bf16.msra.mxu1 %v2481_v25  ;;  %v806_v36 = vsub.f32 %v804_v22, %v805_v28 }
 0x126   :  { %v2174_v38 = vpack.c.bf16 %v696_v29, %v693_v32  ;;  %v811_v40 = vsub.f32 %v655_v27, %v693_v32  ;;  %v799_v42 = vsub.f32 %v797_v26, %v798_v31  ;;  %v2202_v43 = vpack.c.bf16 %v805_v28, %v798_v31 }
 0x127   :  { %v819_v44 = vand.u32 4294901760, %v818_v35  ;;  %v807_v47 = vand.u32 4294901760, %v806_v36 }
 0x128   :  { %v812_v48 = vand.u32 4294901760, %v811_v40  ;;  %2175 = vmatprep.subr.bf16.mxu1 %v2174_v38  ;;  %v800_v49 = vand.u32 4294901760, %v799_v42  ;;  %v2190_v51 = vpack.c.bf16 %v818_v35, %v811_v40 }
 0x129   :  { %2177 = vmatpush3.bf16.msra.mxu1 %v2174_v38  ;;  %v820_v56 = vsub.f32 %v818_v35, %v819_v44 }
 0x12a   :  { %v2178_v57 = vpack.c.bf16 %v807_v47, %v800_v49  ;;  %v813_v58 = vsub.f32 %v811_v40, %v812_v48  ;;  %v2206_v59 = vpack.c.bf16 %v819_v44, %v812_v48 }
 0x12b   :  { %v821_v60 = vand.u32 4294901760, %v820_v56 }
 0x12c   :  { %2029 = vmatmul.mubr.f32.vlgmr.msra.gmra.mrb[4].mxu1 %v769_v46  ;;  %2179 = vmatprep.subr.bf16.mxu1 %v2178_v57  ;;  %v814_v63 = vand.u32 4294901760, %v813_v58 }
 0x12d   :  { %2181 = vmatpush3.bf16.msra.mxu1 %v2178_v57  ;;  %2031 = vmatprep.mubr.f32.mxu1 %v779_v55  ;;  %v1309_v57 = vpop.permute.xlu1 %1308 }
 0x12e   :  { %v2182_v1 = vpack.c.bf16 %v821_v60, %v814_v63 }
 0x130   :  { %2032 = vmatmul.mubr.f32.gmra.mrb[6].mxu1 %v789_v61  ;;  %2183 = vmatprep.subr.bf16.mxu1 %v2182_v1 }
 0x131   :  { %2185 = vmatpush3.bf16.msra.mxu1 %v2182_v1  ;;  %2042 = vmatprep.mubr.f32.mxu1 %v2442_v39 }
 0x132   :  { %2187 = vmatprep.subr.bf16.mxu1 %v2186_v34 }
 0x134   :  { %2043 = vmatmul.mubr.f32.vlgmr.msra.gmra.mrb[4].mxu1 %v2464_v62 }
 0x135   :  { %2189 = vmatpush3.bf16.msra.mxu1 %v2186_v34  ;;  %2045 = vmatprep.mubr.f32.mxu1 %v2466_v0 }
 0x136   :  { %2191 = vmatprep.subr.bf16.mxu1 %v2190_v51 }
 0x138   :  { %2046 = vmatmul.mubr.f32.gmra.mrb[6].mxu1 %v2471_v8 }
 0x139   :  { %2193 = vmatpush3.bf16.msra.mxu1 %v2190_v51  ;;  %2056 = vmatprep.mubr.f32.mxu1 %v2446_v41  ;;  %v2521_v41 = vsub.f32 %v2455_v52, %v2461_v54 }
 0x13a   :  { %2195 = vmatprep.subr.bf16.mxu1 %v2481_v25 }
 0x13c   :  { %2057 = vmatmul.mubr.f32.vlgmr.msra.gmra.mrb[4].mxu1 %v2469_v6 }
 0x13d   :  { %2197 = vmatpush3.bf16.msra.mxu1 %v2481_v25  ;;  %2059 = vmatprep.mubr.f32.mxu1 %v2474_v11 }
 0x13e   :  { %2199 = vmatprep.subr.bf16.mxu1 %v2174_v38 }
 0x140   :  { %2060 = vmatmul.mubr.f32.gmra.mrb[6].mxu1 %v2478_v21 }
 0x141   :  { %2201 = vmatpush3.bf16.msra.mxu1 %v2174_v38  ;;  %2070 = vmatprep.mubr.f32.mxu1 %v757_v45  ;;  %v1391_v45 = vand.u32 4294901760, %v2521_v41 }
 0x142   :  { %2203 = vmatprep.subr.bf16.mxu1 %v2202_v43 }
 0x143   :  { %v1392_v2 = vsub.f32 %v2521_v41, %v1391_v45 }
 0x144   :  { %2071 = vmatmul.mubr.f32.vlgmr.msra.gmra.mrb[4].mxu1 %v767_v18 }
 0x145   :  { %2205 = vmatpush3.bf16.msra.mxu1 %v2202_v43  ;;  %2073 = vmatprep.mubr.f32.mxu1 %v777_v24  ;;  %v1393_v3 = vand.u32 4294901760, %v1392_v2 }
 0x146   :  { %2207 = vmatprep.subr.bf16.mxu1 %v2206_v59 }
 0x148   :  { %2074 = vmatmul.mubr.f32.gmra.mrb[6].mxu1 %v787_v33 }
 0x149   :  { %2209 = vmatpush3.bf16.msra.mxu1 %v2206_v59  ;;  %2084 = vmatprep.mubr.f32.mxu1 %v2442_v39 }
 0x14a   :  { %2211 = vmatprep.subr.bf16.mxu1 %v2481_v25 }
 0x14c   :  { %2085 = vmatmul.mubr.f32.vlgmr.msra.gmra.mrb[4].mxu1 %v2464_v62 }
 0x14d   :  { %2213 = vmatpush3.bf16.msra.mxu1 %v2481_v25  ;;  %2087 = vmatprep.mubr.f32.mxu1 %v2466_v0 }
 0x14e   :  { %2215 = vmatprep.subr.bf16.mxu1 %v2174_v38 }
 0x150   :  { %2088 = vmatmul.mubr.f32.gmra.mrb[6].mxu1 %v2471_v8 }
 0x151   :  { %2217 = vmatpush3.bf16.msra.mxu1 %v2174_v38  ;;  %2098 = vmatprep.mubr.f32.mxu1 %v2442_v39  ;;  %v2528_v39 = vand.u32 4294901760, %v2458_v53 }
 0x153   :  { %v2532_v52 = vsub.f32 %v2458_v53, %v2528_v39 }
 0x154   :  { %2099 = vmatmul.mubr.f32.vlgmr.msra.gmra.mrb[4].mxu1 %v2464_v62  ;;  %v660_v62 = vpop.permute.xlu0 %659 }
 0x155   :  { %2101 = vmatprep.mubr.f32.mxu1 %v2466_v0  ;;  %v1401_v16 = vand.u32 4294901760, %v2532_v52 }
 0x157   :  { %v1402_v25 = vsub.f32 %v2532_v52, %v1401_v16 }
 0x158   :  { %2102 = vmatmul.mubr.f32.gmra.mrb[6].mxu1 %v2471_v8  ;;  %v675_v9 = vpop.permute.xlu0 %674 }
 0x159   :  { %2112 = vmatprep.mubr.f32.mxu1 %v1393_v3  ;;  %v1403_v37 = vand.u32 4294901760, %v1402_v25 }
 0x15c   :  { %v1314_v56 = vpop.permute.xlu0 %1313 }
 0x227   :  { %v2100_v0 = vpop.f32.mrb[4].mxu1 }
 0x228   :  { %v2274_v5 = vadd.f32 %v2100_v0, %v665_v4  ;;  %v1278_v6 = vpop.f32.mrb[5].mxu1 }
 0x229   :  { %v2275_v7 = vadd.f32 %v1278_v6, %v660_v62 }
 0x22a   :  { %v1301_v8 = vmax.f32 %v2274_v5, 0.0 }
 0x22b   :  { %v1300_v10 = vmax.f32 %v2275_v7, 0.0  ;;  %v2103_v11 = vpop.f32.mrb[6].mxu1 }
 0x22c   :  { %v1324_v13 = vand.u32 4294901760, %v1301_v8  ;;  %v2276_v14 = vadd.f32 %v2103_v11, %v675_v9  ;;  %v1290_v15 = vpop.f32.mrb[7].mxu1 }
 0x22d   :  { %v1321_v17 = vand.u32 4294901760, %v1300_v10  ;;  %v2277_v18 = vadd.f32 %v1290_v15, %v670_v12 }
 0x22e   :  { %v1418_v19 = vsub.f32 %v1301_v8, %v1324_v13  ;;  %v1303_v20 = vmax.f32 %v2276_v14, 0.0 }
 0x22f   :  { %v2218_v21 = vpack.c.bf16 %v1324_v13, %v1321_v17  ;;  %v1411_v22 = vsub.f32 %v1300_v10, %v1321_v17  ;;  %v1302_v23 = vmax.f32 %v2277_v18, 0.0 }
 0x230   :  { %v1419_v53 = vand.u32 4294901760, %v1418_v19  ;;  %v1330_v24 = vand.u32 4294901760, %v1303_v20 }
 0x231   :  { %v1412_v26 = vand.u32 4294901760, %v1411_v22  ;;  %v1327_v27 = vand.u32 4294901760, %v1302_v23  ;;  %2219 = vmatprep.subr.bf16.mxu1 %v2218_v21  ;;  %v2234_v28 = vpack.c.bf16 %v1418_v19, %v1411_v22 }
 0x232   :  { %v1432_v29 = vsub.f32 %v1303_v20, %v1330_v24  ;;  %2221 = vmatpush3.bf16.msra.mxu1 %v2218_v21  ;;  %v1420_v30 = vsub.f32 %v1418_v19, %v1419_v53 }
 0x233   :  { %v2222_v31 = vpack.c.bf16 %v1330_v24, %v1327_v27  ;;  %v1425_v32 = vsub.f32 %v1302_v23, %v1327_v27  ;;  %v1413_v33 = vsub.f32 %v1411_v22, %v1412_v26  ;;  %v2250_v34 = vpack.c.bf16 %v1419_v53, %v1412_v26 }
 0x234   :  { %v1433_v35 = vand.u32 4294901760, %v1432_v29  ;;  %v1421_v36 = vand.u32 4294901760, %v1420_v30 }
 0x235   :  { %v1426_v38 = vand.u32 4294901760, %v1425_v32  ;;  %2223 = vmatprep.subr.bf16.mxu1 %v2222_v31  ;;  %v1414_v40 = vand.u32 4294901760, %v1413_v33  ;;  %v2238_v42 = vpack.c.bf16 %v1432_v29, %v1425_v32 }
 0x236   :  { %2225 = vmatpush3.bf16.msra.mxu1 %v2222_v31  ;;  %v1434_v43 = vsub.f32 %v1432_v29, %v1433_v35 }
 0x237   :  { %v2226_v44 = vpack.c.bf16 %v1421_v36, %v1414_v40  ;;  %v1427_v46 = vsub.f32 %v1425_v32, %v1426_v38  ;;  %v2254_v47 = vpack.c.bf16 %v1433_v35, %v1426_v38 }
 0x238   :  { %v1435_v48 = vand.u32 4294901760, %v1434_v43 }
 0x239   :  { %2113 = vmatmul.mubr.f32.vlgmr.msra.gmra.mrb[8].mxu1 %v1403_v37  ;;  %2227 = vmatprep.subr.bf16.mxu0 %v2226_v44  ;;  %v1428_v49 = vand.u32 4294901760, %v1427_v46 }
 0x23a   :  { %2229 = vmatpush3.bf16.msra.mxu0 %v2226_v44 }
 0x23b   :  { %v2230_v50 = vpack.c.bf16 %v1435_v48, %v1428_v49 }
 0x23d   :  { %2231 = vmatprep.subr.bf16.mxu0 %v2230_v50 }
 0x23e   :  { %2233 = vmatpush3.bf16.msra.mxu0 %v2230_v50 }
 0x23f   :  { %2235 = vmatprep.subr.bf16.mxu0 %v2234_v28 }
 0x241   :  { %2124 = vmatmul.mubr.f32.vlgmr.msra.gmra.mrb[4].mxu0 %v2528_v39 }
 0x242   :  { %2237 = vmatpush3.bf16.msra.mxu0 %v2234_v28  ;;  %2134 = vmatprep.mubr.f32.mxu0 %v2521_v41 }
 0x243   :  { %2239 = vmatprep.subr.bf16.mxu0 %v2238_v42 }
 0x246   :  { %2241 = vmatpush3.bf16.msra.mxu0 %v2238_v42 }
 0x247   :  { %2243 = vmatprep.subr.bf16.mxu0 %v2218_v21 }
 0x249   :  { %2135 = vmatmul.mubr.f32.vlgmr.msra.gmra.mrb[4].mxu0 %v2532_v52 }
 0x24a   :  { %2245 = vmatpush3.bf16.msra.mxu0 %v2218_v21  ;;  %2145 = vmatprep.mubr.f32.mxu0 %v1391_v45 }
 0x24b   :  { %2247 = vmatprep.subr.bf16.mxu0 %v2222_v31 }
 0x24e   :  { %2249 = vmatpush3.bf16.msra.mxu0 %v2222_v31 }
 0x24f   :  { %2251 = vmatprep.subr.bf16.mxu0 %v2250_v34 }
 0x251   :  { %2146 = vmatmul.mubr.f32.vlgmr.msra.gmra.mrb[4].mxu0 %v1401_v16 }
 0x252   :  { %2253 = vmatpush3.bf16.msra.mxu0 %v2250_v34  ;;  %2156 = vmatprep.mubr.f32.mxu0 %v2461_v54 }
 0x253   :  { %2255 = vmatprep.subr.bf16.mxu0 %v2254_v47 }
 0x256   :  { %2257 = vmatpush3.bf16.msra.mxu0 %v2254_v47 }
 0x257   :  { %2259 = vmatprep.subr.bf16.mxu0 %v2218_v21 }
 0x259   :  { %2157 = vmatmul.mubr.f32.vlgmr.msra.gmra.mrb[4].mxu0 %v2528_v39 }
 0x25a   :  { %2261 = vmatpush3.bf16.msra.mxu0 %v2218_v21  ;;  %2167 = vmatprep.mubr.f32.mxu0 %v2461_v54 }
 0x25b   :  { %2263 = vmatprep.subr.bf16.mxu0 %v2222_v31 }
 0x25e   :  { %2265 = vmatpush3.bf16.msra.mxu0 %v2222_v31 }
 0x261   :  { %2168 = vmatmul.mubr.f32.vlgmr.msra.gmra.mrb[4].mxu0 %v2528_v39 }
 0x30c   :  { %v2114_v51 = vpop.f32.mrb[8].mxu1 }
 0x30d   :  { %v1395_v55 = vpop.f32.mrb[9].mxu1  ;;  %v1406_v58 = vadd.f32 %v2114_v51, %v1314_v56 }
 0x30e   :  { %v1396_v59 = vadd.f32 %v1395_v55, %v1309_v57 }
 0x334   :  { %v2169_v60 = vpop.f32.mrb[4].mxu0 }
 0x335   :  { %v2279_v61 = vadd.f32 %v2169_v60, %v1406_v58  ;;  %v1838_v63 = vpop.f32.mrb[5].mxu0 }
 0x336   :  { %v2281_v1 = vadd.f32 %v1838_v63, %v1396_v59 }
 0x337   :  { %1851 = vst.msk [vmem:[%s2553_s2 + $0x8] sm:$0x3] %vm1850_vm2, %v2279_v61 }
 0x338   :  { %1849 = vst.msk [vmem:[%s2553_s2] sm:$0xff] %vm1848_vm3, %v2281_v1 }
 0x339   :  { %1856 = vsyncpa [#allocation3], 1 }
 0x33a   :  { %1857 = vsyncpa [#allocation5], 1 }

</bundles_post_ra>
